<compile_context>
chip_gen: v7x
topology: tpu7x:2x2x1
jax: 0.10.0
libtpu: 0.0.40
codegen_flags: <defaults>
</compile_context>

<pallas_src>
import math
import functools

import jax
import jax.numpy as jnp
from jax.experimental import pallas as pl
from jax.experimental.pallas import tpu as pltpu


def _round_up(a, m):
    return (a + m - 1) // m * m


# ----------------------------- kernels ------------------------------------ #

def _pool_mean_kernel(x_ref, o_ref, *, scale):
    # x_ref: (Bt, ncout, g)   o_ref: (Bt, ncout)
    x = x_ref[...].astype(jnp.float32)
    o_ref[...] = (jnp.sum(x, axis=-1) * scale).astype(o_ref.dtype)


def _pool_max_kernel(x_ref, o_ref):
    # x_ref: (Bt, ncout, g)   o_ref: (Bt, ncout)
    o_ref[...] = jnp.max(x_ref[...], axis=-1).astype(o_ref.dtype)


def _trunc_kernel(x_ref, o_ref, *, ncout):
    # x_ref: (Bt, Cin_blk)    o_ref: (Bt, ncout)
    o_ref[...] = x_ref[:, :ncout].astype(o_ref.dtype)


# ----------------------------- wrapper ------------------------------------- #

_VMEM_LIMIT = 48 * 1024 * 1024    # safe on v7x (64 MiB) and v5e/v6e (128 MiB)
_TILE_BUDGET = 12 * 1024 * 1024   # target bytes for double-buffered in+out tiles


def _pick_batch_tile(batch, row_bytes):
    """Largest batch tile whose (double-buffered, padded) VMEM fits the budget."""
    bt = max(1, _TILE_BUDGET // max(row_bytes, 1))
    if bt >= batch:
        return batch
    return max(8, (bt // 8) * 8)   # keep the output sublane dim 8-aligned


class PoolingLinear:
    """JAX/Pallas port of the PyTorch PoolingLinear module (forward only)."""

    def __init__(self, ncin, ncout, agg="mean"):
        self.ncin = ncin
        self.ncout = ncout
        self.agg = agg

    def __call__(self, x):
        # TODO(synk): only 2-D (batch, ncin) inputs are supported (the common use).
        assert x.ndim == 2, "PoolingLinear expects (batch, ncin) inputs"
        bs, cin = x.shape
        assert cin == self.ncin, f"expected {self.ncin} features, got {cin}"
        ncout = self.ncout
        dtype = x.dtype
        itemsize = jnp.dtype(dtype).itemsize

        if self.agg == "trunc":
            # Read only the first ncout columns when that is lane-aligned,
            # otherwise read the full (lane-dense) row and slice in-kernel.
            in_c = ncout if (ncout % 128 == 0) else cin
            row_bytes = 2 * (_round_up(in_c, 128) + _round_up(ncout, 128)) * itemsize
            bt = _pick_batch_tile(bs, row_bytes)
            return pl.pallas_call(
                functools.partial(_trunc_kernel, ncout=ncout),
                out_shape=jax.ShapeDtypeStruct((bs, ncout), dtype),
                grid_spec=pltpu.PrefetchScalarGridSpec(
                    num_scalar_prefetch=0,
                    grid=(pl.cdiv(bs, bt),),
                    in_specs=[pl.BlockSpec((bt, in_c), lambda b: (b, 0))],
                    out_specs=pl.BlockSpec((bt, ncout), lambda b: (b, 0)),
                ),
                compiler_params=pltpu.CompilerParams(
                    dimension_semantics=("parallel",),
                    vmem_limit_bytes=_VMEM_LIMIT,
                ),
            )(x)

        if self.agg not in ("mean", "max"):
            raise ValueError(f"unknown agg mode {self.agg!r}")

        # k is the *float* ratio; the group size is int(k) (matches torch).
        k = 1.0 * self.ncin / self.ncout
        g = int(k)
        assert g >= 1, "ncin must be >= ncout for mean/max pooling"

        # (bs, ncout*g) -> (bs, ncout, g): contiguous row-major reshape (free).
        x_g = x[:, : ncout * g].reshape(bs, ncout, g)

        # Conservative padded-VMEM estimate per batch row (input + output), x2
        # for double buffering; g pads to a full 128-lane vreg row.
        row_bytes = 2 * (
            _round_up(ncout, 8) * _round_up(g, 128) + _round_up(ncout, 128)
        ) * max(itemsize, 4)
        bt = _pick_batch_tile(bs, row_bytes)

        if self.agg == "mean":
            kernel = functools.partial(_pool_mean_kernel, scale=math.sqrt(k) / g)
        else:
            kernel = _pool_max_kernel

        return pl.pallas_call(
            kernel,
            out_shape=jax.ShapeDtypeStruct((bs, ncout), dtype),
            grid_spec=pltpu.PrefetchScalarGridSpec(
                num_scalar_prefetch=0,
                grid=(pl.cdiv(bs, bt),),
                in_specs=[pl.BlockSpec((bt, ncout, g), lambda b: (b, 0, 0))],
                out_specs=pl.BlockSpec((bt, ncout), lambda b: (b, 0)),
            ),
            compiler_params=pltpu.CompilerParams(
                dimension_semantics=("parallel",),
                vmem_limit_bytes=_VMEM_LIMIT,
            ),
        )(x_g)


# ----------------------------- test --------------------------------------- #

if __name__ == "__main__":
    key = jax.random.PRNGKey(0)
    bs, ncin, ncout = 4, 64, 16          # k = 4 groups of 4 features
    x = jax.random.normal(key, (bs, ncin), dtype=jnp.float32)

    k = 1.0 * ncin / ncout
    g = int(k)
    x_g = x[:, : ncout * g].reshape(bs, ncout, g)

    # mean
    out_mean = jax.block_until_ready(PoolingLinear(ncin, ncout, agg="mean")(x))
    ref_mean = math.sqrt(k) * x_g.mean(axis=2)
    assert out_mean.shape == (bs, ncout)
    assert jnp.allclose(out_mean, ref_mean, atol=1e-5, rtol=1e-5), "mean mismatch"

    # max
    out_max = jax.block_until_ready(PoolingLinear(ncin, ncout, agg="max")(x))
    ref_max = x_g.max(axis=2)
    assert out_max.shape == (bs, ncout)
    assert jnp.allclose(out_max, ref_max), "max mismatch"

    # trunc
    out_tr = jax.block_until_ready(PoolingLinear(ncin, ncout, agg="trunc")(x))
    assert out_tr.shape == (bs, ncout)
    assert jnp.allclose(out_tr, x[:, :ncout]), "trunc mismatch"

    print("KERNEL_OK")
</pallas_src>

<mosaic_0001>
module attributes {stable_mosaic.version = 11 : i64} {
  func.func @_pool_mean_kernel(%arg0: i32, %arg1: memref<4x16x4xf32, #tpu.memory_space<vmem>>, %arg2: memref<4x16xf32, #tpu.memory_space<vmem>>) attributes {dimension_semantics = [#tpu.dimension_semantics<parallel>], iteration_bounds = array<i64: 1>, scalar_prefetch = 0 : i64, scratch_operands = 0 : i64, tpu.core_type = #tpu.core_type<tc>, window_params = [{transform_indices = @transform_0, window_bounds = array<i64: 4, 16, 4>}, {transform_indices = @transform_1, window_bounds = array<i64: 4, 16>}]} {
    %c0 = arith.constant 0 : index
    %c0_0 = arith.constant 0 : index
    %c0_1 = arith.constant 0 : index
    %0 = vector.load %arg1[%c0, %c0_0, %c0_1] : memref<4x16x4xf32, #tpu.memory_space<vmem>>, vector<4x16x4xf32>
    %cst = arith.constant dense<0.000000e+00> : vector<4x16xf32>
    %1 = vector.multi_reduction <add>, %0, %cst [2] : vector<4x16x4xf32> to vector<4x16xf32>
    %cst_2 = arith.constant 5.000000e-01 : f32
    %2 = vector.broadcast %cst_2 : f32 to vector<4x16xf32>
    %3 = arith.mulf %1, %2 : vector<4x16xf32>
    %c0_3 = arith.constant 0 : index
    %c0_4 = arith.constant 0 : index
    %4 = vector.load %arg2[%c0_3, %c0_4] : memref<4x16xf32, #tpu.memory_space<vmem>>, vector<4x16xf32>
    tpu.vector_store %arg2[%c0_3, %c0_4], %3 {strides = array<i32>} : memref<4x16xf32, #tpu.memory_space<vmem>>, vector<4x16xf32>,
    return
  }
  func.func @transform_0(%arg0: i32) -> (i32, i32, i32) {
    %c0_i32 = arith.constant 0 : i32
    %c0_i32_0 = arith.constant 0 : i32
    %c0_i32_1 = arith.constant 0 : i32
    return %arg0, %c0_i32, %c0_i32_0 : i32, i32, i32
  }
  func.func @transform_1(%arg0: i32) -> (i32, i32) {
    %c0_i32 = arith.constant 0 : i32
    %c0_i32_0 = arith.constant 0 : i32
    return %arg0, %c0_i32 : i32, i32
  }
}

</mosaic_0001>

<bundles_post_ra>
// kernel: tpu_custom_call.1
= control target key start
LH: loop header
LB: loop body
LE: loop exit
PB: predicated region body
PF: predicated region fallthrough
CT: control target
= control target key end

     0   :  { %vm17_vm0 = vcmask 31744   ;;  %s205_s0 = inlined_call_operand.vmem [shape: f32[4,16,4], index: 0, kind: input, shape index: {}]   ;;  %s206_s1 = inlined_call_operand.hbm [shape: f32[4,16], index: 1, kind: output, shape index: {}]  }
   0x1   :  { %v11_v0 = vld [vmem:[%s205_s0 + $0x10] sm:$0xff]  ;;  %v9_v1 = vld [vmem:[%s205_s0] sm:$0xff]  ;;  %v12_v2 = vld [vmem:[%s205_s0 + $0x18] sm:$0xff] }
   0x2   :  { %v24_v3 = vsel %vm17_vm0, %v11_v0, 0.0  ;;  %v18_v4 = vsel %vm17_vm0, %v9_v1, 0.0  ;;  %v10_v5 = vld [vmem:[%s205_s0 + $0x8] sm:$0xff]  ;;  %v27_v6 = vsel %vm17_vm0, %v12_v2, 0.0 }
   0x3   :  { %25 = vadd.xlane.f32.xlu1 %v24_v3  ;;  %19 = vadd.xlane.f32.xlu0 %v18_v4  ;;  %v21_v7 = vsel %vm17_vm0, %v10_v5, 0.0 }
   0x4   :  { %6 = vsyncpa [#allocation3], 0  ;;  %v14_v8 = vld [vmem:[%s205_s0 + $0x28] sm:$0xff]  ;;  %v13_v9 = vld [vmem:[%s205_s0 + $0x20] sm:$0xff]  ;;  %v58_v16 = vlaneseq  ;;  %vm69_vm1 = vcmask 130112   ;;  %vm98_vm2 = vcmask 1041409  }
   0x5   :  { %v33_v10 = vsel %vm17_vm0, %v14_v8, 0.0  ;;  %v30_v11 = vsel %vm17_vm0, %v13_v9, 0.0  ;;  %v16_v12 = vld [vmem:[%s205_s0 + $0x38] sm:$0xff]  ;;  %v15_v13 = vld [vmem:[%s205_s0 + $0x30] sm:$0xff]  ;;  %vm100_vm3 = vcmask 1042434   ;;  %s146_s0 = smov [#allocation2]  }
   0x6   :  { %v39_v14 = vsel %vm17_vm0, %v16_v12, 0.0  ;;  %v36_v15 = vsel %vm17_vm0, %v15_v13, 0.0  ;;  %v59_v17 = vand.u32 127, %v58_v16  ;;  %v61_v21 = vshrl.u32 %v58_v16, 7  ;;  %s113_s22 = sshll.u32 %s146_s0, 4  ;;  %s114_s22 = int_to_ptr.vmem [resolvable:$true] %s113_s22 }
   0x7   :  { %28 = vadd.xlane.f32.xlu1 %v27_v6  ;;  %22 = vadd.xlane.f32.xlu0 %v21_v7  ;;  %vm102_vm4 = vcmask 1043459   ;;  %vm105_vm5 = vcmask 125952   ;;  %s122_s23 = scalar_lea.vmem %s114_s22, 64  ;;  %p127_p1 = scmp.lt.s32.totalorder %s114_s22, %s114_s22 }
   0x8   :  { %v64_v20 = vadd.s32 4294967288, %v59_v17  ;;  %v62_v27 = vsub.s32 %v59_v17, %v61_v21  ;;  %p123_p0 = scmp.ne.s32.totalorder %s114_s22, %s122_s23  ;;  %p128_p2 = scmp.lt.s32.totalorder %s122_s23, %s122_s23 }
   0xa   :  { %v67_v24 = vsub.s32 %v64_v20, %v61_v21  ;;  %p129_p3 = por %p128_p2, %p127_p1 }
   0xb   :  { %34 = vadd.xlane.f32.xlu1 %v33_v10  ;;  %31 = vadd.xlane.f32.xlu0 %v30_v11 }
   0xc   :  { %p130_p4 = pnand %p129_p3, %p123_p0 }
   0xf   :  { %40 = vadd.xlane.f32.xlu1 %v39_v14  ;;  %37 = vadd.xlane.f32.xlu0 %v36_v15 }
  0x90   :  { %v26_v18 = vpop.xlane.xlu1 %25  ;;  %v20_v19 = vpop.xlane.xlu0 %19 }
  0x91   :  { %v44_v28 = vmul.f32 0.5, %v26_v18  ;;  %v42_v29 = vmul.f32 0.5, %v20_v19 }
  0x93   :  { %v74_v36 = vrot.slane %v44_v28, %v62_v27  ;;  %v63_v37 = vrot.slane %v42_v29, %v62_v27 }
  0x94   :  { %v29_v22 = vpop.xlane.xlu1 %28  ;;  %v23_v23 = vpop.xlane.xlu0 %22 }
  0x95   :  { %v45_v25 = vmul.f32 0.5, %v29_v22  ;;  %v43_v26 = vmul.f32 0.5, %v23_v23 }
  0x97   :  { %v78_v32 = vrot.slane %v45_v25, %v67_v24  ;;  %v68_v33 = vrot.slane %v43_v26, %v67_v24 }
  0x98   :  { %v35_v30 = vpop.xlane.xlu1 %34  ;;  %v32_v31 = vpop.xlane.xlu0 %31 }
  0x99   :  { %v47_v34 = vmul.f32 0.5, %v35_v30  ;;  %v46_v35 = vmul.f32 0.5, %v32_v31  ;;  %v79_v42 = vsel %vm69_vm1, %v78_v32, %v74_v36  ;;  %v70_v43 = vsel %vm69_vm1, %v68_v33, %v63_v37 }
  0x9a   :  { %v99_v49 = vsel %vm98_vm2, %v79_v42, %v70_v43 }
  0x9b   :  { %v87_v38 = vrot.slane %v47_v34, %v67_v24  ;;  %v83_v39 = vrot.slane %v46_v35, %v62_v27 }
  0x9c   :  { %v41_v40 = vpop.xlane.xlu1 %40  ;;  %v38_v41 = vpop.xlane.xlu0 %37 }
  0x9d   :  { %v49_v44 = vmul.f32 0.5, %v41_v40  ;;  %v48_v45 = vmul.f32 0.5, %v38_v41  ;;  %v88_v46 = vsel %vm69_vm1, %v87_v38, %v83_v39 }
  0x9e   :  { %v101_v51 = vsel %vm100_vm3, %v88_v46, %v99_v49 }
  0x9f   :  { %v96_v47 = vrot.slane %v49_v44, %v67_v24  ;;  %v92_v48 = vrot.slane %v48_v45, %v62_v27 }
  0xa1   :  { %v97_v50 = vsel %vm69_vm1, %v96_v47, %v92_v48 }
  0xa2   :  { %v103_v52 = vsel %vm102_vm4, %v97_v50, %v101_v51 }
  0xa3   :  { %106 = vst.msk [vmem:[#allocation2] sm:$0xf] %vm105_vm5, %v103_v52 }
  0xa4   :  { %133 = shalt.err (!%p130_p4)
}
  0xa5   :  { %s134_s26 = scalar_lea.hbm %s206_s1, 64 }
  0xa6   :  { %p135_p5 = scmp.ne.s32.totalorder %s206_s1, %s134_s26  ;;  %p138_p6 = scmp.lt.u32.totalorder %s134_s26, %s206_s1 }
  0xa8   :  { %p140_p7 = pnand %p138_p6, %p135_p5 }
  0xaa   :  { %143 = shalt.err (!%p140_p7)
}
  0xab   :  { %116 = dma.vmem_to_hbm [thread:$0]  %s114_s22, 64, %s206_s1, [#allocation3]  }
  0xac   :  { %144 = dma.done.wait [#allocation3], 64  }
  0xad   :  { %145 = vsyncadd [#allocation3], 4294967232 }
  0xae   :  { %120 = vsyncpa [#allocation3], 1 }

</bundles_post_ra>
